<compile_context>
chip_gen: v6e
topology: v6e:2x2x1
jax: 0.10.0
libtpu: 0.0.40
codegen_flags: <defaults>
</compile_context>

<pallas_src>
import math

import jax
import jax.numpy as jnp
from jax.experimental import pallas as pl
from jax.experimental.pallas import tpu as pltpu

_INV_SQRT2 = 1.0 / math.sqrt(2.0)


def _round_up(n, m):
    return (n + m - 1) // m * m


def _cdiv(a, b):
    return (a + b - 1) // b


def _make_kernel(has_mask, approx_gelu):
    def _gelu(h):
        if approx_gelu:
            # tanh form -> EUP slot (free while the MXU is busy).
            return jax.nn.gelu(h, approximate=True)
        # erf form, matching torch.nn.GELU() default.
        return 0.5 * h * (1.0 + jax.lax.erf(h * _INV_SQRT2))

    def _body(x_ref, w1_ref, b1_ref, w2_ref, b2_ref, keep_ref, o_ref, acc_ref):
        k = pl.program_id(1)

        @pl.when(k == 0)
        def _init():
            acc_ref[...] = jnp.zeros_like(acc_ref)

        # Linear 1 on the MXU (native / bf16 inputs, f32 accumulate); bias +
        # GELU in f32.  Dropout: eval-mode identity.
        # TODO(synk): training-mode dropout would need pltpu.prng_seed /
        # pltpu.prng_random_bits masking.
        h = jnp.dot(x_ref[...].astype(w1_ref.dtype), w1_ref[...],
                    preferred_element_type=jnp.float32)
        h = _gelu(h + b1_ref[...])
        # Linear 2 partial product for this d_ff block, accumulated in f32.
        acc_ref[...] += jnp.dot(h.astype(w2_ref.dtype), w2_ref[...],
                                preferred_element_type=jnp.float32)

        @pl.when(k == pl.num_programs(1) - 1)
        def _finalize():
            y = acc_ref[...] + b2_ref[...]
            if keep_ref is not None:
                # Precomputed [rows, 1] row-valid vector: cheap VPU select.
                y = jnp.where(keep_ref[...] > 0.5, y, 0.0)
            o_ref[...] = y.astype(o_ref.dtype)

    if has_mask:
        def kernel(x_ref, w1_ref, b1_ref, w2_ref, b2_ref, keep_ref, o_ref,
                   acc_ref):
            _body(x_ref, w1_ref, b1_ref, w2_ref, b2_ref, keep_ref, o_ref,
                  acc_ref)
    else:
        def kernel(x_ref, w1_ref, b1_ref, w2_ref, b2_ref, o_ref, acc_ref):
            _body(x_ref, w1_ref, b1_ref, w2_ref, b2_ref, None, o_ref, acc_ref)
    return kernel


def _choose_tiles(R, dm_in, dm_p, df_p, x_bytes, w_bytes, has_mask, vmem_cap,
                  block_rows):
    """Pick (row tile, d_ff tile) so the pipelined footprint fits vmem_cap."""
    budget = max(vmem_cap - (8 << 20), 16 << 20)

    if block_rows is None:
        # v5e/v6e (128 MiB physical) -> 512 rows; v7x (64 MiB) -> 256 rows.
        block_rows = 512 if vmem_cap >= (96 << 20) else 256
    br = max(16, min(int(block_rows), _round_up(R, 16)))
    # Keep >= 2 row steps when there is enough work so the "parallel" axis can
    # split across v7x's two TensorCores.
    if R > 256 and _cdiv(R, br) < 2:
        br = _round_up(_cdiv(R, 2), 16)

    def fixed_bytes(rows):
        # x tile (2x), out tile (2x), f32 accumulator, keep vector, b2.
        return (2 * rows * dm_in * x_bytes + 2 * rows * dm_p * x_bytes
                + rows * dm_p * 4 + (2 * rows * 4 if has_mask else 0)
                + 2 * dm_p * 4)

    def per_col_bytes(rows):
        # Double-buffered W1 column + W2 row + b1 entry + live f32 h column.
        return 2 * (dm_in + dm_p) * w_bytes + 2 * 4 + rows * 4

    while br > 128 and budget - fixed_bytes(br) < 128 * per_col_bytes(br):
        br = max(128, _round_up(br // 2, 16))

    avail = budget - fixed_bytes(br)
    df_blk = (avail // per_col_bytes(br)) // 128 * 128
    df_blk = int(max(128, min(df_blk, df_p)))
    return br, df_blk


def positionwise_feed_forward(x, w1, b1, w2, b2, mask=None, *,
                              block_rows=None, use_bf16_matmul=False,
                              approximate_gelu=False):
    """x: [B, S, d_model]; w1: [d_model, d_ff]; b1: [d_ff];
    w2: [d_ff, d_model]; b2: [d_model]; mask: optional [B, S, K]."""
    B, S, d_model = x.shape
    d_ff = w1.shape[1]
    R = B * S
    has_mask = mask is not None

    x_bytes = jnp.dtype(x.dtype).itemsize
    dm_in = d_model                       # x / W1-rows stay unpadded
    dm_p = _round_up(d_model, 128)        # lane-dense output / W2-cols / b2

    # Generation-aware VMEM ceiling with headroom for compiler scratch
    # (v7x: 64 MiB physical -> ~48 MiB; v5e/v6e: 128 MiB -> ~96 MiB).
    try:
        vmem_capacity = int(pltpu.get_tpu_info().vmem_capacity_bytes)
    except Exception:
        vmem_capacity = 64 << 20
    vmem_cap = max(32 << 20, (vmem_capacity * 3) // 4)

    # Opt-in bf16 MXU path for f32 weights (2-4x MXU rate, ~1e-3 rel error).
    if use_bf16_matmul and jnp.dtype(w1.dtype) == jnp.float32:
        w1 = w1.astype(jnp.bfloat16)
        w2 = w2.astype(jnp.bfloat16)
    w_bytes = jnp.dtype(w1.dtype).itemsize

    br, df_blk = _choose_tiles(R, dm_in, dm_p, _round_up(d_ff, 128),
                               x_bytes, w_bytes, has_mask, vmem_cap,
                               block_rows)
    df_pad = _round_up(d_ff, df_blk)
    num_i = _cdiv(R, br)
    num_k = df_pad // df_blk

    # Parameter padding (zero padding keeps the math exact: GELU(0)=0 and zero
    # W2 rows contribute nothing).  No-op for 128-aligned model sizes; for
    # per-layer inference loops callers should pass pre-padded params (or jit
    # this wrapper so XLA hoists the constant pads).
    if df_pad != d_ff:
        w1 = jnp.pad(w1, ((0, 0), (0, df_pad - d_ff)))
        b1 = jnp.pad(b1, (0, df_pad - d_ff))
        w2 = jnp.pad(w2, ((0, df_pad - d_ff), (0, 0)))
    if dm_p != d_model:
        w2 = jnp.pad(w2, ((0, 0), (0, dm_p - d_model)))
        b2 = jnp.pad(b2, (0, dm_p - d_model))
    b1_2d = b1.reshape(1, df_pad).astype(jnp.float32)
    b2_2d = b2.reshape(1, dm_p).astype(jnp.float32)

    xf = x.reshape(R, dm_in)              # reshape only; x is never padded
    args = [xf, w1, b1_2d, w2, b2_2d]
    if has_mask:
        keep = (mask.reshape(R, -1).astype(jnp.float32).sum(axis=-1) > 0.0)
        args.append(keep.astype(jnp.float32).reshape(R, 1))

    kernel = _make_kernel(has_mask, approximate_gelu)

    # VMEM budget and cost hints.
    w_mult = 1 if num_k == 1 else 2
    est = (2 * br * dm_in * x_bytes
           + w_mult * (dm_in + dm_p) * df_blk * w_bytes
           + w_mult * df_blk * 4 + dm_p * 4
           + (2 * br * 4 if has_mask else 0)
           + 2 * br * dm_p * x_bytes
           + br * dm_p * 4                      # accumulator scratch
           + br * df_blk * 4 + br * dm_p * 4)   # live f32 intermediates
    vmem_limit = int(min(max(est + (8 << 20), 32 << 20), vmem_cap))

    cost = pl.CostEstimate(
        flops=2 * R * dm_in * df_pad + 2 * R * df_pad * dm_p,
        transcendentals=R * df_pad,
        bytes_accessed=int(R * dm_in * x_bytes + R * dm_p * x_bytes
                           + (dm_in + dm_p) * df_pad * w_bytes
                           + (df_pad + dm_p) * 4
                           + (R * 4 if has_mask else 0)))

    def _spec(shape, index_map, single_buffer):
        if single_buffer:
            # Grid-invariant block: one buffer is enough (halves weight VMEM).
            return pl.BlockSpec(shape, index_map, pipeline_mode=pl.Buffered(1))
        return pl.BlockSpec(shape, index_map)

    def _call(single_buffer_consts):
        sb_w = single_buffer_consts and num_k == 1   # weights grid-invariant
        in_specs = [
            _spec((br, dm_in), lambda i, k: (i, 0), False),
            _spec((dm_in, df_blk), lambda i, k: (0, k), sb_w),
            _spec((1, df_blk), lambda i, k: (0, k), sb_w),
            _spec((df_blk, dm_p), lambda i, k: (k, 0), sb_w),
            _spec((1, dm_p), lambda i, k: (0, 0), single_buffer_consts),
        ]
        if has_mask:
            in_specs.append(_spec((br, 1), lambda i, k: (i, 0), False))
        return pl.pallas_call(
            kernel,
            out_shape=jax.ShapeDtypeStruct((R, dm_p), x.dtype),
            grid_spec=pltpu.PrefetchScalarGridSpec(
                num_scalar_prefetch=0,
                grid=(num_i, num_k),        # rows first, d_ff reduction last
                in_specs=in_specs,
                out_specs=pl.BlockSpec((br, dm_p), lambda i, k: (i, 0)),
                scratch_shapes=[pltpu.VMEM((br, dm_p), jnp.float32)]),
            compiler_params=pltpu.CompilerParams(
                dimension_semantics=("parallel", "arbitrary"),
                vmem_limit_bytes=vmem_limit),
            cost_estimate=cost,
        )(*args)

    try:
        out = jax.block_until_ready(_call(True))
    except Exception:
        # Conservative fallback if single-buffered blocks are not supported.
        out = _call(False)

    if dm_p != d_model:
        out = out[:, :d_model]
    return out.reshape(B, S, d_model)


def _reference(x, w1, b1, w2, b2, mask=None):
    h = jnp.dot(x, w1) + b1
    h = 0.5 * h * (1.0 + jax.lax.erf(h / jnp.sqrt(2.0)))
    y = jnp.dot(h, w2) + b2
    if mask is not None:
        keep = (mask.sum(axis=-1) > 0)[..., None]
        y = jnp.where(keep, y, 0.0)
    return y


if __name__ == "__main__":
    # Small shapes consistent with the module: tokens [B, S, d_model].
    B, S, d_model, d_ff = 2, 8, 32, 64

    key = jax.random.PRNGKey(0)
    kx, kw1, kb1, kw2, kb2, km = jax.random.split(key, 6)

    x = jax.random.normal(kx, (B, S, d_model), dtype=jnp.float32)
    lim1 = 1.0 / math.sqrt(d_model)
    lim2 = 1.0 / math.sqrt(d_ff)
    w1 = jax.random.uniform(kw1, (d_model, d_ff), jnp.float32, -lim1, lim1)
    b1 = jax.random.uniform(kb1, (d_ff,), jnp.float32, -lim1, lim1)
    w2 = jax.random.uniform(kw2, (d_ff, d_model), jnp.float32, -lim2, lim2)
    b2 = jax.random.uniform(kb2, (d_model,), jnp.float32, -lim2, lim2)

    # Mask [B, S, S] with some all-zero rows (those token rows must zero out).
    mask = (jax.random.uniform(km, (B, S, S)) > 0.3).astype(jnp.float32)
    mask = mask.at[0, 3, :].set(0.0)
    mask = mask.at[1, 6, :].set(0.0)

    # Tolerance allows for MXU default-precision differences between the
    # Pallas matmuls and the XLA reference matmuls; semantic checks (masked
    # rows exactly zero) are strict.
    ATOL = RTOL = 1e-2

    # Masked path.
    y = jax.block_until_ready(positionwise_feed_forward(x, w1, b1, w2, b2, mask))
    y_ref = _reference(x, w1, b1, w2, b2, mask)
    assert jnp.allclose(y, y_ref, atol=ATOL, rtol=RTOL), "mismatch (masked)"
    assert bool(jnp.all(y[0, 3] == 0.0)) and bool(jnp.all(y[1, 6] == 0.0)), \
        "masked rows not zeroed"

    # No-mask path (separate, leaner kernel variant).
    y2 = jax.block_until_ready(positionwise_feed_forward(x, w1, b1, w2, b2, None))
    y2_ref = _reference(x, w1, b1, w2, b2, None)
    assert jnp.allclose(y2, y2_ref, atol=ATOL, rtol=RTOL), "mismatch (no mask)"

    print("KERNEL_OK")
</pallas_src>

<mosaic_0001>
module attributes {stable_mosaic.version = 11 : i64} {
  func.func @kernel(%arg0: i32, %arg1: i32, %arg2: memref<16x32xf32, #tpu.memory_space<vmem>>, %arg3: memref<32x128xf32, #tpu.memory_space<vmem>>, %arg4: memref<1x128xf32, #tpu.memory_space<vmem>>, %arg5: memref<128x128xf32, #tpu.memory_space<vmem>>, %arg6: memref<1x128xf32, #tpu.memory_space<vmem>>, %arg7: memref<16x1xf32, #tpu.memory_space<vmem>>, %arg8: memref<16x128xf32, #tpu.memory_space<vmem>>, %arg9: memref<16x128xf32, #tpu.memory_space<vmem>>) attributes {dimension_semantics = [#tpu.dimension_semantics<parallel>, #tpu.dimension_semantics<arbitrary>], iteration_bounds = array<i64: 1, 1>, scalar_prefetch = 0 : i64, scratch_operands = 1 : i64, tpu.core_type = #tpu.core_type<tc>, window_params = [{transform_indices = @transform_0, window_bounds = array<i64: 16, 32>}, {pipeline_mode = #tpu.pipeline_mode<synchronous>, transform_indices = @transform_1, window_bounds = array<i64: 32, 128>}, {pipeline_mode = #tpu.pipeline_mode<synchronous>, transform_indices = @transform_2, window_bounds = array<i64: 1, 128>}, {pipeline_mode = #tpu.pipeline_mode<synchronous>, transform_indices = @transform_3, window_bounds = array<i64: 128, 128>}, {pipeline_mode = #tpu.pipeline_mode<synchronous>, transform_indices = @transform_4, window_bounds = array<i64: 1, 128>}, {transform_indices = @transform_5, window_bounds = array<i64: 16, 1>}, {transform_indices = @transform_6, window_bounds = array<i64: 16, 128>}]} {
    %c0_i32 = arith.constant 0 : i32
    %0 = arith.cmpi eq, %arg1, %c0_i32 : i32
    %1 = arith.extui %0 : i1 to i32
    %c0_i32_0 = arith.constant 0 : i32
    %2 = arith.cmpi ne, %1, %c0_i32_0 : i32
    scf.if %2 {
      %cst_18 = arith.constant 0.000000e+00 : f32
      %25 = vector.broadcast %cst_18 : f32 to vector<16x128xf32>
      %c0_19 = arith.constant 0 : index
      %c0_20 = arith.constant 0 : index
      %26 = vector.load %arg9[%c0_19, %c0_20] : memref<16x128xf32, #tpu.memory_space<vmem>>, vector<16x128xf32>
      tpu.vector_store %arg9[%c0_19, %c0_20], %25 {strides = array<i32>} : memref<16x128xf32, #tpu.memory_space<vmem>>, vector<16x128xf32>,
    } else {
    }
    %c0 = arith.constant 0 : index
    %c0_1 = arith.constant 0 : index
    %3 = vector.load %arg2[%c0, %c0_1] : memref<16x32xf32, #tpu.memory_space<vmem>>, vector<16x32xf32>
    %c0_2 = arith.constant 0 : index
    %c0_3 = arith.constant 0 : index
    %4 = vector.load %arg3[%c0_2, %c0_3] : memref<32x128xf32, #tpu.memory_space<vmem>>, vector<32x128xf32>
    %cst = arith.constant dense<0.000000e+00> : vector<16x128xf32>
    %5 = tpu.matmul %3, %4, %cst {dimension_numbers = #tpu.dot_dimension_numbers<[1], [0], [0], [1], [0, 0, 1, 1], [], []>} : vector<16x32xf32>, vector<32x128xf32>, vector<16x128xf32> -> vector<16x128xf32>
    %c0_4 = arith.constant 0 : index
    %c0_5 = arith.constant 0 : index
    %6 = vector.load %arg4[%c0_4, %c0_5] : memref<1x128xf32, #tpu.memory_space<vmem>>, vector<1x128xf32>
    %7 = vector.broadcast %6 : vector<1x128xf32> to vector<16x128xf32>
    %8 = arith.addf %5, %7 : vector<16x128xf32>
    %cst_6 = arith.constant 5.000000e-01 : f32
    %9 = vector.broadcast %cst_6 : f32 to vector<16x128xf32>
    %10 = arith.mulf %9, %8 : vector<16x128xf32>
    %cst_7 = arith.constant 0.707106769 : f32
    %11 = vector.broadcast %cst_7 : f32 to vector<16x128xf32>
    %12 = arith.mulf %8, %11 : vector<16x128xf32>
    %13 = math.erf %12 : vector<16x128xf32>
    %cst_8 = arith.constant 1.000000e+00 : f32
    %14 = vector.broadcast %cst_8 : f32 to vector<16x128xf32>
    %15 = arith.addf %14, %13 : vector<16x128xf32>
    %16 = arith.mulf %10, %15 : vector<16x128xf32>
    %c0_9 = arith.constant 0 : index
    %c0_10 = arith.constant 0 : index
    %17 = vector.load %arg9[%c0_9, %c0_10] : memref<16x128xf32, #tpu.memory_space<vmem>>, vector<16x128xf32>
    %c0_11 = arith.constant 0 : index
    %c0_12 = arith.constant 0 : index
    %18 = vector.load %arg5[%c0_11, %c0_12] : memref<128x128xf32, #tpu.memory_space<vmem>>, vector<128x128xf32>
    %cst_13 = arith.constant dense<0.000000e+00> : vector<16x128xf32>
    %19 = tpu.matmul %16, %18, %cst_13 {dimension_numbers = #tpu.dot_dimension_numbers<[1], [0], [0], [1], [0, 0, 1, 1], [], []>} : vector<16x128xf32>, vector<128x128xf32>, vector<16x128xf32> -> vector<16x128xf32>
    %20 = arith.addf %17, %19 : vector<16x128xf32>
    %c0_14 = arith.constant 0 : index
    %c0_15 = arith.constant 0 : index
    %21 = vector.load %arg9[%c0_14, %c0_15] : memref<16x128xf32, #tpu.memory_space<vmem>>, vector<16x128xf32>
    tpu.vector_store %arg9[%c0_14, %c0_15], %20 {strides = array<i32>} : memref<16x128xf32, #tpu.memory_space<vmem>>, vector<16x128xf32>,
    %c0_i32_16 = arith.constant 0 : i32
    %22 = arith.cmpi eq, %arg1, %c0_i32_16 : i32
    %23 = arith.extui %22 : i1 to i32
    %c0_i32_17 = arith.constant 0 : i32
    %24 = arith.cmpi ne, %23, %c0_i32_17 : i32
    scf.if %24 {
      %c0_18 = arith.constant 0 : index
      %c0_19 = arith.constant 0 : index
      %25 = vector.load %arg9[%c0_18, %c0_19] : memref<16x128xf32, #tpu.memory_space<vmem>>, vector<16x128xf32>
      %c0_20 = arith.constant 0 : index
      %c0_21 = arith.constant 0 : index
      %26 = vector.load %arg6[%c0_20, %c0_21] : memref<1x128xf32, #tpu.memory_space<vmem>>, vector<1x128xf32>
      %27 = vector.broadcast %26 : vector<1x128xf32> to vector<16x128xf32>
      %28 = arith.addf %25, %27 : vector<16x128xf32>
      %c0_22 = arith.constant 0 : index
      %c0_23 = arith.constant 0 : index
      %29 = vector.load %arg7[%c0_22, %c0_23] : memref<16x1xf32, #tpu.memory_space<vmem>>, vector<16x1xf32>
      %cst_24 = arith.constant 5.000000e-01 : f32
      %30 = vector.broadcast %cst_24 : f32 to vector<16x1xf32>
      %31 = arith.cmpf ogt, %29, %30 : vector<16x1xf32>
      %cst_25 = arith.constant 0.000000e+00 : f32
      %32 = vector.shape_cast %31 : vector<16x1xi1> to vector<16x1xi1>
      %33 = vector.broadcast %32 : vector<16x1xi1> to vector<16x128xi1>
      %34 = vector.broadcast %cst_25 : f32 to vector<16x128xf32>
      %35 = arith.select %33, %28, %34 : vector<16x128xi1>, vector<16x128xf32>
      %c0_26 = arith.constant 0 : index
      %c0_27 = arith.constant 0 : index
      %36 = vector.load %arg8[%c0_26, %c0_27] : memref<16x128xf32, #tpu.memory_space<vmem>>, vector<16x128xf32>
      tpu.vector_store %arg8[%c0_26, %c0_27], %35 {strides = array<i32>} : memref<16x128xf32, #tpu.memory_space<vmem>>, vector<16x128xf32>,
    } else {
    }
    return
  }
  func.func @transform_0(%arg0: i32, %arg1: i32) -> (i32, i32) {
    %c0_i32 = arith.constant 0 : i32
    %c0_i32_0 = arith.constant 0 : i32
    return %arg0, %c0_i32 : i32, i32
  }
  func.func @transform_1(%arg0: i32, %arg1: i32) -> (i32, i32) {
    %c0_i32 = arith.constant 0 : i32
    %c0_i32_0 = arith.constant 0 : i32
    return %c0_i32, %arg1 : i32, i32
  }
  func.func @transform_2(%arg0: i32, %arg1: i32) -> (i32, i32) {
    %c0_i32 = arith.constant 0 : i32
    %c0_i32_0 = arith.constant 0 : i32
    return %c0_i32, %arg1 : i32, i32
  }
  func.func @transform_3(%arg0: i32, %arg1: i32) -> (i32, i32) {
    %c0_i32 = arith.constant 0 : i32
    %c0_i32_0 = arith.constant 0 : i32
    return %arg1, %c0_i32 : i32, i32
  }
  func.func @transform_4(%arg0: i32, %arg1: i32) -> (i32, i32) {
    %c0_i32 = arith.constant 0 : i32
    %c0_i32_0 = arith.constant 0 : i32
    %c0_i32_1 = arith.constant 0 : i32
    return %c0_i32, %c0_i32_0 : i32, i32
  }
  func.func @transform_5(%arg0: i32, %arg1: i32) -> (i32, i32) {
    %c0_i32 = arith.constant 0 : i32
    %c0_i32_0 = arith.constant 0 : i32
    return %arg0, %c0_i32 : i32, i32
  }
  func.func @transform_6(%arg0: i32, %arg1: i32) -> (i32, i32) {
    %c0_i32 = arith.constant 0 : i32
    %c0_i32_0 = arith.constant 0 : i32
    return %arg0, %c0_i32 : i32, i32
  }
}

module attributes {stable_mosaic.version = 11 : i64} {
  func.func @kernel(%arg0: i32, %arg1: i32, %arg2: memref<16x32xf32, #tpu.memory_space<vmem>>, %arg3: memref<32x128xf32, #tpu.memory_space<vmem>>, %arg4: memref<1x128xf32, #tpu.memory_space<vmem>>, %arg5: memref<128x128xf32, #tpu.memory_space<vmem>>, %arg6: memref<1x128xf32, #tpu.memory_space<vmem>>, %arg7: memref<16x1xf32, #tpu.memory_space<vmem>>, %arg8: memref<16x128xf32, #tpu.memory_space<vmem>>, %arg9: memref<16x128xf32, #tpu.memory_space<vmem>>) attributes {dimension_semantics = [#tpu.dimension_semantics<parallel>, #tpu.dimension_semantics<arbitrary>], iteration_bounds = array<i64: 1, 1>, scalar_prefetch = 0 : i64, scratch_operands = 1 : i64, tpu.core_type = #tpu.core_type<tc>, window_params = [{transform_indices = @transform_0, window_bounds = array<i64: 16, 32>}, {transform_indices = @transform_1, window_bounds = array<i64: 32, 128>}, {transform_indices = @transform_2, window_bounds = array<i64: 1, 128>}, {transform_indices = @transform_3, window_bounds = array<i64: 128, 128>}, {pipeline_mode = #tpu.pipeline_mode<synchronous>, transform_indices = @transform_4, window_bounds = array<i64: 1, 128>}, {transform_indices = @transform_5, window_bounds = array<i64: 16, 1>}, {transform_indices = @transform_6, window_bounds = array<i64: 16, 128>}]} {
    %c0_i32 = arith.constant 0 : i32
    %0 = arith.cmpi eq, %arg1, %c0_i32 : i32
    %1 = arith.extui %0 : i1 to i32
    %c0_i32_0 = arith.constant 0 : i32
    %2 = arith.cmpi ne, %1, %c0_i32_0 : i32
    scf.if %2 {
      %cst_18 = arith.constant 0.000000e+00 : f32
      %25 = vector.broadcast %cst_18 : f32 to vector<16x128xf32>
      %c0_19 = arith.constant 0 : index
      %c0_20 = arith.constant 0 : index
      %26 = vector.load %arg9[%c0_19, %c0_20] : memref<16x128xf32, #tpu.memory_space<vmem>>, vector<16x128xf32>
      tpu.vector_store %arg9[%c0_19, %c0_20], %25 {strides = array<i32>} : memref<16x128xf32, #tpu.memory_space<vmem>>, vector<16x128xf32>,
    } else {
    }
    %c0 = arith.constant 0 : index
    %c0_1 = arith.constant 0 : index
    %3 = vector.load %arg2[%c0, %c0_1] : memref<16x32xf32, #tpu.memory_space<vmem>>, vector<16x32xf32>
    %c0_2 = arith.constant 0 : index
    %c0_3 = arith.constant 0 : index
    %4 = vector.load %arg3[%c0_2, %c0_3] : memref<32x128xf32, #tpu.memory_space<vmem>>, vector<32x128xf32>
    %cst = arith.constant dense<0.000000e+00> : vector<16x128xf32>
    %5 = tpu.matmul %3, %4, %cst {dimension_numbers = #tpu.dot_dimension_numbers<[1], [0], [0], [1], [0, 0, 1, 1], [], []>} : vector<16x32xf32>, vector<32x128xf32>, vector<16x128xf32> -> vector<16x128xf32>
    %c0_4 = arith.constant 0 : index
    %c0_5 = arith.constant 0 : index
    %6 = vector.load %arg4[%c0_4, %c0_5] : memref<1x128xf32, #tpu.memory_space<vmem>>, vector<1x128xf32>
    %7 = vector.broadcast %6 : vector<1x128xf32> to vector<16x128xf32>
    %8 = arith.addf %5, %7 : vector<16x128xf32>
    %cst_6 = arith.constant 5.000000e-01 : f32
    %9 = vector.broadcast %cst_6 : f32 to vector<16x128xf32>
    %10 = arith.mulf %9, %8 : vector<16x128xf32>
    %cst_7 = arith.constant 0.707106769 : f32
    %11 = vector.broadcast %cst_7 : f32 to vector<16x128xf32>
    %12 = arith.mulf %8, %11 : vector<16x128xf32>
    %13 = math.erf %12 : vector<16x128xf32>
    %cst_8 = arith.constant 1.000000e+00 : f32
    %14 = vector.broadcast %cst_8 : f32 to vector<16x128xf32>
    %15 = arith.addf %14, %13 : vector<16x128xf32>
    %16 = arith.mulf %10, %15 : vector<16x128xf32>
    %c0_9 = arith.constant 0 : index
    %c0_10 = arith.constant 0 : index
    %17 = vector.load %arg9[%c0_9, %c0_10] : memref<16x128xf32, #tpu.memory_space<vmem>>, vector<16x128xf32>
    %c0_11 = arith.constant 0 : index
    %c0_12 = arith.constant 0 : index
    %18 = vector.load %arg5[%c0_11, %c0_12] : memref<128x128xf32, #tpu.memory_space<vmem>>, vector<128x128xf32>
    %cst_13 = arith.constant dense<0.000000e+00> : vector<16x128xf32>
    %19 = tpu.matmul %16, %18, %cst_13 {dimension_numbers = #tpu.dot_dimension_numbers<[1], [0], [0], [1], [0, 0, 1, 1], [], []>} : vector<16x128xf32>, vector<128x128xf32>, vector<16x128xf32> -> vector<16x128xf32>
    %20 = arith.addf %17, %19 : vector<16x128xf32>
    %c0_14 = arith.constant 0 : index
    %c0_15 = arith.constant 0 : index
    %21 = vector.load %arg9[%c0_14, %c0_15] : memref<16x128xf32, #tpu.memory_space<vmem>>, vector<16x128xf32>
    tpu.vector_store %arg9[%c0_14, %c0_15], %20 {strides = array<i32>} : memref<16x128xf32, #tpu.memory_space<vmem>>, vector<16x128xf32>,
    %c0_i32_16 = arith.constant 0 : i32
    %22 = arith.cmpi eq, %arg1, %c0_i32_16 : i32
    %23 = arith.extui %22 : i1 to i32
    %c0_i32_17 = arith.constant 0 : i32
    %24 = arith.cmpi ne, %23, %c0_i32_17 : i32
    scf.if %24 {
      %c0_18 = arith.constant 0 : index
      %c0_19 = arith.constant 0 : index
      %25 = vector.load %arg9[%c0_18, %c0_19] : memref<16x128xf32, #tpu.memory_space<vmem>>, vector<16x128xf32>
      %c0_20 = arith.constant 0 : index
      %c0_21 = arith.constant 0 : index
      %26 = vector.load %arg6[%c0_20, %c0_21] : memref<1x128xf32, #tpu.memory_space<vmem>>, vector<1x128xf32>
      %27 = vector.broadcast %26 : vector<1x128xf32> to vector<16x128xf32>
      %28 = arith.addf %25, %27 : vector<16x128xf32>
      %c0_22 = arith.constant 0 : index
      %c0_23 = arith.constant 0 : index
      %29 = vector.load %arg7[%c0_22, %c0_23] : memref<16x1xf32, #tpu.memory_space<vmem>>, vector<16x1xf32>
      %cst_24 = arith.constant 5.000000e-01 : f32
      %30 = vector.broadcast %cst_24 : f32 to vector<16x1xf32>
      %31 = arith.cmpf ogt, %29, %30 : vector<16x1xf32>
      %cst_25 = arith.constant 0.000000e+00 : f32
      %32 = vector.shape_cast %31 : vector<16x1xi1> to vector<16x1xi1>
      %33 = vector.broadcast %32 : vector<16x1xi1> to vector<16x128xi1>
      %34 = vector.broadcast %cst_25 : f32 to vector<16x128xf32>
      %35 = arith.select %33, %28, %34 : vector<16x128xi1>, vector<16x128xf32>
      %c0_26 = arith.constant 0 : index
      %c0_27 = arith.constant 0 : index
      %36 = vector.load %arg8[%c0_26, %c0_27] : memref<16x128xf32, #tpu.memory_space<vmem>>, vector<16x128xf32>
      tpu.vector_store %arg8[%c0_26, %c0_27], %35 {strides = array<i32>} : memref<16x128xf32, #tpu.memory_space<vmem>>, vector<16x128xf32>,
    } else {
    }
    return
  }
  func.func @transform_0(%arg0: i32, %arg1: i32) -> (i32, i32) {
    %c0_i32 = arith.constant 0 : i32
    %c0_i32_0 = arith.constant 0 : i32
    return %arg0, %c0_i32 : i32, i32
  }
  func.func @transform_1(%arg0: i32, %arg1: i32) -> (i32, i32) {
    %c0_i32 = arith.constant 0 : i32
    %c0_i32_0 = arith.constant 0 : i32
    return %c0_i32, %arg1 : i32, i32
  }
  func.func @transform_2(%arg0: i32, %arg1: i32) -> (i32, i32) {
    %c0_i32 = arith.constant 0 : i32
    %c0_i32_0 = arith.constant 0 : i32
    return %c0_i32, %arg1 : i32, i32
  }
  func.func @transform_3(%arg0: i32, %arg1: i32) -> (i32, i32) {
    %c0_i32 = arith.constant 0 : i32
    %c0_i32_0 = arith.constant 0 : i32
    return %arg1, %c0_i32 : i32, i32
  }
  func.func @transform_4(%arg0: i32, %arg1: i32) -> (i32, i32) {
    %c0_i32 = arith.constant 0 : i32
    %c0_i32_0 = arith.constant 0 : i32
    %c0_i32_1 = arith.constant 0 : i32
    return %c0_i32, %c0_i32_0 : i32, i32
  }
  func.func @transform_5(%arg0: i32, %arg1: i32) -> (i32, i32) {
    %c0_i32 = arith.constant 0 : i32
    %c0_i32_0 = arith.constant 0 : i32
    return %arg0, %c0_i32 : i32, i32
  }
  func.func @transform_6(%arg0: i32, %arg1: i32) -> (i32, i32) {
    %c0_i32 = arith.constant 0 : i32
    %c0_i32_0 = arith.constant 0 : i32
    return %arg0, %c0_i32 : i32, i32
  }
}

</mosaic_0001>

<bundles_post_ra>
// kernel: tpu_custom_call.1
= control target key start
LH: loop header
LB: loop body
LE: loop exit
PB: predicated region body
PF: predicated region fallthrough
CT: control target
= control target key end

     0   :  { %11 = vsyncpa [#allocation4], 0  ;;  %s540_s0 = inlined_call_operand.vmem [shape: f32[16,32], index: 0, kind: input, shape index: {}]   ;;  %s541_s1 = inlined_call_operand.hbm [shape: f32[32,128], index: 1, kind: input, shape index: {}]   ;;  %s542_s2 = inlined_call_operand.vmem [shape: f32[1,128], index: 2, kind: input, shape index: {}]   ;;  %s543_s3 = inlined_call_operand.hbm [shape: f32[128,128], index: 3, kind: input, shape index: {}]   ;;  %s544_s4 = inlined_call_operand.vmem [shape: f32[1,128], index: 4, kind: input, shape index: {}]   ;;  %s545_s5 = inlined_call_operand.vmem [shape: f32[16,1], index: 5, kind: input, shape index: {}]   ;;  %s546_s6 = inlined_call_operand.hbm [shape: f32[16,128], index: 6, kind: output, shape index: {}]  }
   0x1   :  { %12 = vsyncpa [#allocation7], 0 }
   0x2   :  { %13 = vsyncpa [#allocation5], 0  ;;  %s461_s21 = smov [#allocation3]  }
   0x3   :  { %s21_s22 = sshll.u32 %s461_s21, 4  ;;  %s22_s22 = int_to_ptr.vmem [resolvable:$true] %s21_s22 }
   0x4   :  { %s403_s23 = scalar_lea.vmem %s22_s22, 512  ;;  %p408_p1 = scmp.lt.s32.totalorder %s22_s22, %s22_s22 }
   0x5   :  { %p404_p0 = scmp.ne.s32.totalorder %s22_s22, %s403_s23  ;;  %p409_p2 = scmp.lt.s32.totalorder %s403_s23, %s403_s23 }
   0x7   :  { %p410_p3 = por %p409_p2, %p408_p1 }
   0x9   :  { %p411_p4 = pnand %p410_p3, %p404_p0 }
   0xb   :  { %414 = shalt.err (!%p411_p4)
}
   0xc   :  { %s462_s24 = smov 128   ;;  %s463_s25 = smov 8  }
   0xd   :  { %27 = dma.hbm_to_vmem [thread:$0]  %s541_s1, 512, %s22_s22, [#allocation4], %s462_s24, %s462_s24, %s463_s25  }
   0xe   :  { %s464_s28 = smov [#allocation6]  }
   0xf   :  { %s35_s29 = sshll.u32 %s464_s28, 4  ;;  %s36_s29 = int_to_ptr.vmem [resolvable:$true] %s35_s29 }
  0x10   :  { %s423_s30 = scalar_lea.vmem %s36_s29, 2048  ;;  %p428_p6 = scmp.lt.s32.totalorder %s36_s29, %s36_s29 }
  0x11   :  { %p424_p5 = scmp.ne.s32.totalorder %s36_s29, %s423_s30  ;;  %p429_p7 = scmp.lt.s32.totalorder %s423_s30, %s423_s30 }
  0x13   :  { %p430_p8 = por %p429_p7, %p428_p6 }
  0x15   :  { %p431_p9 = pnand %p430_p8, %p424_p5 }
  0x17   :  { %434 = shalt.err (!%p431_p9)
}
  0x18   :  { %41 = dma.hbm_to_vmem [thread:$0]  %s543_s3, 2048, %s36_s29, [#allocation7], %s462_s24, %s462_s24, %s463_s25  }
  0x19   :  { %455 = dma.done.wait [#allocation4], 512  }
  0x1a   :  { %456 = vsyncadd [#allocation4], 4294966784 }
  0x1b   :  { %457 = dma.done.wait [#allocation7], 2048  }
  0x1c   :  { %458 = vsyncadd [#allocation7], 4294965248  ;;  %vm71_vm0 = vcmask 261120   ;;  %v63_v0 = vld [vmem:[#allocation3 + $0x18] sm:$0xff]  ;;  %v62_v1 = vld [vmem:[#allocation3 + $0x10] sm:$0xff]  ;;  %v465_v24 = vmov 0  }
  0x1d   :  { %338 = vmatprep.subr.mxu0 %v63_v0  ;;  %v58_v2 = vld [vmem:[%s540_s0] sm:$0xff]  ;;  %v61_v3 = vld [vmem:[#allocation3 + $0x8] sm:$0xff]  ;;  %v180_v4 = vld [vmem:[#allocation6 + $0x78] sm:$0xff]  ;;  %390 = vset.pattern.permute.xlu0 %v465_v24  ;;  %s466_s16 = smov [#allocation8]  }
  0x1e   :  { %339 = vmatpush3.msra.mxu0 %v63_v0  ;;  %346 = vmatprep.mubr.msk.f32.mxu0 %vm71_vm0, %v58_v2  ;;  %v179_v5 = vld [vmem:[#allocation6 + $0x70] sm:$0xff]  ;;  %v60_v6 = vld [vmem:[#allocation3] sm:$0xff]  ;;  %v178_v7 = vld [vmem:[#allocation6 + $0x68] sm:$0xff]  ;;  %s297_s17 = sshll.u32 %s466_s16, 4  ;;  %s298_s17 = int_to_ptr.vmem [resolvable:$true] %s297_s17 }
  0x1f   :  { %340 = vmatprep.subr.mxu0 %v62_v1  ;;  %349 = vmatprep.subr.mxu1 %v180_v4  ;;  %v59_v8 = vld [vmem:[%s540_s0 + $0x8] sm:$0xff]  ;;  %v177_v9 = vld [vmem:[#allocation6 + $0x60] sm:$0xff]  ;;  %v176_v10 = vld [vmem:[#allocation6 + $0x58] sm:$0xff]  ;;  %s435_s18 = scalar_lea.vmem %s298_s17, 256  ;;  %p440_p11 = scmp.lt.s32.totalorder %s298_s17, %s298_s17 }
  0x20   :  { %341 = vmatpush3.msra.mxu0 %v62_v1  ;;  %350 = vmatpush3.msra.mxu1 %v180_v4  ;;  %v175_v11 = vld [vmem:[#allocation6 + $0x50] sm:$0xff]  ;;  %v174_v12 = vld [vmem:[#allocation6 + $0x48] sm:$0xff]  ;;  %v173_v13 = vld [vmem:[#allocation6 + $0x40] sm:$0xff]  ;;  %p436_p10 = scmp.ne.s32.totalorder %s298_s17, %s435_s18  ;;  %p441_p12 = scmp.lt.s32.totalorder %s435_s18, %s435_s18 }
  0x21   :  { %342 = vmatprep.subr.mxu0 %v61_v3  ;;  %351 = vmatprep.subr.mxu1 %v179_v5  ;;  %v172_v14 = vld [vmem:[#allocation6 + $0x38] sm:$0xff]  ;;  %v171_v15 = vld [vmem:[#allocation6 + $0x30] sm:$0xff]  ;;  %v170_v16 = vld [vmem:[#allocation6 + $0x28] sm:$0xff] }
  0x22   :  { %343 = vmatpush3.msra.mxu0 %v61_v3  ;;  %352 = vmatpush3.msra.mxu1 %v179_v5  ;;  %v169_v17 = vld [vmem:[#allocation6 + $0x20] sm:$0xff]  ;;  %v168_v18 = vld [vmem:[#allocation6 + $0x18] sm:$0xff]  ;;  %v167_v19 = vld [vmem:[#allocation6 + $0x10] sm:$0xff]  ;;  %p442_p13 = por %p441_p12, %p440_p11 }
  0x23   :  { %344 = vmatprep.subr.mxu0 %v60_v6  ;;  %353 = vmatprep.subr.mxu1 %v178_v7  ;;  %v166_v20 = vld [vmem:[#allocation6 + $0x8] sm:$0xff]  ;;  %v165_v21 = vld [vmem:[#allocation6] sm:$0xff] }
  0x24   :  { %345 = vmatpush3.msra.mxu0 %v60_v6  ;;  %354 = vmatpush3.msra.mxu1 %v178_v7  ;;  %v274_v22 = vld [vmem:[%s545_s5] sm:$0xff]  ;;  %v275_v23 = vld [vmem:[%s545_s5 + $0x8] sm:$0xff]  ;;  %p443_p0 = pnand %p442_p13, %p436_p10 }
  0x25   :  { %347 = vmatmul.mubr.msk.f32.vlgmr.msra.gmra.mxu0 %vm71_vm0, %v59_v8  ;;  %355 = vmatprep.subr.mxu1 %v177_v9  ;;  %vm276_vm1 = vcmp.gt.f32.partialorder %v274_v22, 0.5  ;;  %vm277_vm2 = vcmp.gt.f32.partialorder %v275_v23, 0.5  ;;  %v310_v27 = vld [vmem:[%s542_s2] ss:$0 sm:$0xff] }
  0x26   :  { %356 = vmatpush3.msra.mxu1 %v177_v9  ;;  %v278_v25 = vsel %vm276_vm1, 1, %v465_v24  ;;  %v279_v26 = vsel %vm277_vm2, 1, %v465_v24  ;;  %v313_v43 = vld [vmem:[%s544_s4] ss:$0 sm:$0xff] }
  0x27   :  { %357 = vmatprep.subr.mxu1 %v176_v10  ;;  %281 = vperm.xlu0 %390, %v278_v25  }
  0x28   :  { %358 = vmatpush3.msra.mxu1 %v176_v10 }
  0x29   :  { %359 = vmatprep.subr.mxu1 %v175_v11 }
  0x2a   :  { %360 = vmatpush3.msra.mxu1 %v175_v11 }
  0x2b   :  { %361 = vmatprep.subr.mxu1 %v174_v12  ;;  %284 = vperm.xlu0 %390, %v279_v26  }
  0x2c   :  { %362 = vmatpush3.msra.mxu1 %v174_v12 }
  0x2d   :  { %363 = vmatprep.subr.mxu1 %v173_v13 }
  0x2e   :  { %364 = vmatpush3.msra.mxu1 %v173_v13 }
  0x2f   :  { %365 = vmatprep.subr.mxu1 %v172_v14 }
  0x30   :  { %366 = vmatpush3.msra.mxu1 %v172_v14 }
  0x31   :  { %367 = vmatprep.subr.mxu1 %v171_v15 }
  0x32   :  { %368 = vmatpush3.msra.mxu1 %v171_v15 }
  0x33   :  { %369 = vmatprep.subr.mxu1 %v170_v16 }
  0x34   :  { %370 = vmatpush3.msra.mxu1 %v170_v16 }
  0x35   :  { %371 = vmatprep.subr.mxu1 %v169_v17 }
  0x36   :  { %372 = vmatpush3.msra.mxu1 %v169_v17 }
  0x37   :  { %373 = vmatprep.subr.mxu1 %v168_v18 }
  0x38   :  { %374 = vmatpush3.msra.mxu1 %v168_v18 }
  0x39   :  { %375 = vmatprep.subr.mxu1 %v167_v19 }
  0x3a   :  { %376 = vmatpush3.msra.mxu1 %v167_v19 }
  0x3b   :  { %377 = vmatprep.subr.mxu1 %v166_v20 }
  0x3c   :  { %378 = vmatpush3.msra.mxu1 %v166_v20 }
  0x3d   :  { %379 = vmatprep.subr.mxu1 %v165_v21 }
  0x3e   :  { %380 = vmatpush3.msra.mxu1 %v165_v21 }
  0xa2   :  { %v282_v42 = vpop.permute.xlu0 %281 }
  0xa3   :  { %vm286_vm4 = vcmp.eq.s32.totalorder %v282_v42, 1 }
  0xa6   :  { %v285_v44 = vpop.permute.xlu0 %284 }
  0xa7   :  { %vm287_vm3 = vcmp.eq.s32.totalorder %v285_v44, 1 }
  0xe5   :  { %v348_v28 = vpop.f32.mrf.mxu0 }
  0xe6   :  { %v150_v29 = vadd.f32 %v348_v28, %v310_v27 }
  0xe7   :  { %v144_v30 = vpop.f32.mrf.mxu0 }
  0xe8   :  { %v156_v31 = vmul.f32 0.70710677, %v150_v29  ;;  %v145_v32 = vadd.f32 %v310_v27, %v144_v30  ;;  %v154_v39 = vmul.f32 0.5, %v150_v29 }
  0xea   :  { %391 = verf.f32 %v156_v31  ;;  %v155_v33 = vmul.f32 0.70710677, %v145_v32  ;;  %v153_v37 = vmul.f32 0.5, %v145_v32 }
  0xec   :  { %393 = verf.f32 %v155_v33 }
  0xf7   :  { %v392_v34 = vpop.eup %391 }
  0xf8   :  { %v160_v36 = vadd.f32 1.0, %v392_v34 }
  0xf9   :  { %v394_v35 = vpop.eup %393 }
  0xfa   :  { %v159_v38 = vadd.f32 1.0, %v394_v35  ;;  %v162_v41 = vmul.f32 %v160_v36, %v154_v39 }
  0xfc   :  { %v161_v40 = vmul.f32 %v159_v38, %v153_v37 }
  0xfe   :  { %381 = vmatprep.mubr.f32.mxu1 %v161_v40 }
  0xff   :  { %382 = vmatmul.mubr.f32.vlgmr.msra.gmra.mxu1 %v162_v41 }
 0x1bf   :  { %v383_v45 = vpop.f32.mrf.mxu1 }
 0x1c0   :  { %v273_v46 = vadd.f32 %v383_v45, %v313_v43 }
 0x1c1   :  { %v247_v47 = vpop.f32.mrf.mxu1 }
 0x1c2   :  { %v289_v48 = vsel %vm287_vm3, %v273_v46, 0.0  ;;  %v272_v49 = vadd.f32 %v313_v43, %v247_v47 }
 0x1c3   :  { %291 = vst [vmem:[#allocation8 + $0x8] sm:$0xff] %v289_v48 }
 0x1c4   :  { %v288_v50 = vsel %vm286_vm4, %v272_v49, 0.0 }
 0x1c5   :  { %290 = vst [vmem:[#allocation8] sm:$0xff] %v288_v50 }
 0x1c6   :  { %446 = shalt.err (!%p443_p0)
}
 0x1c7   :  { %303 = dma.vmem_to_hbm [thread:$0]  %s298_s17, 256, %s546_s6, [#allocation5], %s462_s24, %s462_s24, %s463_s25  }
 0x1c8   :  { %459 = dma.done.wait [#allocation5], 256  }
 0x1c9   :  { %460 = vsyncadd [#allocation5], 4294967040 }
 0x1ca   :  { %307 = vsyncpa [#allocation4], 1 }
 0x1cb   :  { %308 = vsyncpa [#allocation7], 1 }
 0x1cc   :  { %309 = vsyncpa [#allocation5], 1 }

// kernel: tpu_custom_call.1
= control target key start
LH: loop header
LB: loop body
LE: loop exit
PB: predicated region body
PF: predicated region fallthrough
CT: control target
= control target key end

     0   :  { %11 = vsyncpa [#allocation4], 0  ;;  %s540_s0 = inlined_call_operand.vmem [shape: f32[16,32], index: 0, kind: input, shape index: {}]   ;;  %s541_s1 = inlined_call_operand.hbm [shape: f32[32,128], index: 1, kind: input, shape index: {}]   ;;  %s542_s2 = inlined_call_operand.vmem [shape: f32[1,128], index: 2, kind: input, shape index: {}]   ;;  %s543_s3 = inlined_call_operand.hbm [shape: f32[128,128], index: 3, kind: input, shape index: {}]   ;;  %s544_s4 = inlined_call_operand.vmem [shape: f32[1,128], index: 4, kind: input, shape index: {}]   ;;  %s545_s5 = inlined_call_operand.vmem [shape: f32[16,1], index: 5, kind: input, shape index: {}]   ;;  %s546_s6 = inlined_call_operand.hbm [shape: f32[16,128], index: 6, kind: output, shape index: {}]  }
   0x1   :  { %12 = vsyncpa [#allocation7], 0 }
   0x2   :  { %13 = vsyncpa [#allocation5], 0  ;;  %s461_s21 = smov [#allocation3]  }
   0x3   :  { %s21_s22 = sshll.u32 %s461_s21, 4  ;;  %s22_s22 = int_to_ptr.vmem [resolvable:$true] %s21_s22 }
   0x4   :  { %s403_s23 = scalar_lea.vmem %s22_s22, 512  ;;  %p408_p1 = scmp.lt.s32.totalorder %s22_s22, %s22_s22 }
   0x5   :  { %p404_p0 = scmp.ne.s32.totalorder %s22_s22, %s403_s23  ;;  %p409_p2 = scmp.lt.s32.totalorder %s403_s23, %s403_s23 }
   0x7   :  { %p410_p3 = por %p409_p2, %p408_p1 }
   0x9   :  { %p411_p4 = pnand %p410_p3, %p404_p0 }
   0xb   :  { %414 = shalt.err (!%p411_p4)
}
   0xc   :  { %s462_s24 = smov 128   ;;  %s463_s25 = smov 8  }
   0xd   :  { %27 = dma.hbm_to_vmem [thread:$0]  %s541_s1, 512, %s22_s22, [#allocation4], %s462_s24, %s462_s24, %s463_s25  }
   0xe   :  { %s464_s28 = smov [#allocation6]  }
   0xf   :  { %s35_s29 = sshll.u32 %s464_s28, 4  ;;  %s36_s29 = int_to_ptr.vmem [resolvable:$true] %s35_s29 }
  0x10   :  { %s423_s30 = scalar_lea.vmem %s36_s29, 2048  ;;  %p428_p6 = scmp.lt.s32.totalorder %s36_s29, %s36_s29 }
  0x11   :  { %p424_p5 = scmp.ne.s32.totalorder %s36_s29, %s423_s30  ;;  %p429_p7 = scmp.lt.s32.totalorder %s423_s30, %s423_s30 }
  0x13   :  { %p430_p8 = por %p429_p7, %p428_p6 }
  0x15   :  { %p431_p9 = pnand %p430_p8, %p424_p5 }
  0x17   :  { %434 = shalt.err (!%p431_p9)
}
  0x18   :  { %41 = dma.hbm_to_vmem [thread:$0]  %s543_s3, 2048, %s36_s29, [#allocation7], %s462_s24, %s462_s24, %s463_s25  }
  0x19   :  { %455 = dma.done.wait [#allocation4], 512  }
  0x1a   :  { %456 = vsyncadd [#allocation4], 4294966784 }
  0x1b   :  { %457 = dma.done.wait [#allocation7], 2048  }
  0x1c   :  { %458 = vsyncadd [#allocation7], 4294965248  ;;  %vm71_vm0 = vcmask 261120   ;;  %v63_v0 = vld [vmem:[#allocation3 + $0x18] sm:$0xff]  ;;  %v62_v1 = vld [vmem:[#allocation3 + $0x10] sm:$0xff]  ;;  %v465_v24 = vmov 0  }
  0x1d   :  { %338 = vmatprep.subr.mxu0 %v63_v0  ;;  %v58_v2 = vld [vmem:[%s540_s0] sm:$0xff]  ;;  %v61_v3 = vld [vmem:[#allocation3 + $0x8] sm:$0xff]  ;;  %v180_v4 = vld [vmem:[#allocation6 + $0x78] sm:$0xff]  ;;  %390 = vset.pattern.permute.xlu0 %v465_v24  ;;  %s466_s16 = smov [#allocation8]  }
  0x1e   :  { %339 = vmatpush3.msra.mxu0 %v63_v0  ;;  %346 = vmatprep.mubr.msk.f32.mxu0 %vm71_vm0, %v58_v2  ;;  %v179_v5 = vld [vmem:[#allocation6 + $0x70] sm:$0xff]  ;;  %v60_v6 = vld [vmem:[#allocation3] sm:$0xff]  ;;  %v178_v7 = vld [vmem:[#allocation6 + $0x68] sm:$0xff]  ;;  %s297_s17 = sshll.u32 %s466_s16, 4  ;;  %s298_s17 = int_to_ptr.vmem [resolvable:$true] %s297_s17 }
  0x1f   :  { %340 = vmatprep.subr.mxu0 %v62_v1  ;;  %349 = vmatprep.subr.mxu1 %v180_v4  ;;  %v59_v8 = vld [vmem:[%s540_s0 + $0x8] sm:$0xff]  ;;  %v177_v9 = vld [vmem:[#allocation6 + $0x60] sm:$0xff]  ;;  %v176_v10 = vld [vmem:[#allocation6 + $0x58] sm:$0xff]  ;;  %s435_s18 = scalar_lea.vmem %s298_s17, 256  ;;  %p440_p11 = scmp.lt.s32.totalorder %s298_s17, %s298_s17 }
  0x20   :  { %341 = vmatpush3.msra.mxu0 %v62_v1  ;;  %350 = vmatpush3.msra.mxu1 %v180_v4  ;;  %v175_v11 = vld [vmem:[#allocation6 + $0x50] sm:$0xff]  ;;  %v174_v12 = vld [vmem:[#allocation6 + $0x48] sm:$0xff]  ;;  %v173_v13 = vld [vmem:[#allocation6 + $0x40] sm:$0xff]  ;;  %p436_p10 = scmp.ne.s32.totalorder %s298_s17, %s435_s18  ;;  %p441_p12 = scmp.lt.s32.totalorder %s435_s18, %s435_s18 }
  0x21   :  { %342 = vmatprep.subr.mxu0 %v61_v3  ;;  %351 = vmatprep.subr.mxu1 %v179_v5  ;;  %v172_v14 = vld [vmem:[#allocation6 + $0x38] sm:$0xff]  ;;  %v171_v15 = vld [vmem:[#allocation6 + $0x30] sm:$0xff]  ;;  %v170_v16 = vld [vmem:[#allocation6 + $0x28] sm:$0xff] }
  0x22   :  { %343 = vmatpush3.msra.mxu0 %v61_v3  ;;  %352 = vmatpush3.msra.mxu1 %v179_v5  ;;  %v169_v17 = vld [vmem:[#allocation6 + $0x20] sm:$0xff]  ;;  %v168_v18 = vld [vmem:[#allocation6 + $0x18] sm:$0xff]  ;;  %v167_v19 = vld [vmem:[#allocation6 + $0x10] sm:$0xff]  ;;  %p442_p13 = por %p441_p12, %p440_p11 }
  0x23   :  { %344 = vmatprep.subr.mxu0 %v60_v6  ;;  %353 = vmatprep.subr.mxu1 %v178_v7  ;;  %v166_v20 = vld [vmem:[#allocation6 + $0x8] sm:$0xff]  ;;  %v165_v21 = vld [vmem:[#allocation6] sm:$0xff] }
  0x24   :  { %345 = vmatpush3.msra.mxu0 %v60_v6  ;;  %354 = vmatpush3.msra.mxu1 %v178_v7  ;;  %v274_v22 = vld [vmem:[%s545_s5] sm:$0xff]  ;;  %v275_v23 = vld [vmem:[%s545_s5 + $0x8] sm:$0xff]  ;;  %p443_p0 = pnand %p442_p13, %p436_p10 }
  0x25   :  { %347 = vmatmul.mubr.msk.f32.vlgmr.msra.gmra.mxu0 %vm71_vm0, %v59_v8  ;;  %355 = vmatprep.subr.mxu1 %v177_v9  ;;  %vm276_vm1 = vcmp.gt.f32.partialorder %v274_v22, 0.5  ;;  %vm277_vm2 = vcmp.gt.f32.partialorder %v275_v23, 0.5  ;;  %v310_v27 = vld [vmem:[%s542_s2] ss:$0 sm:$0xff] }
  0x26   :  { %356 = vmatpush3.msra.mxu1 %v177_v9  ;;  %v278_v25 = vsel %vm276_vm1, 1, %v465_v24  ;;  %v279_v26 = vsel %vm277_vm2, 1, %v465_v24  ;;  %v313_v43 = vld [vmem:[%s544_s4] ss:$0 sm:$0xff] }
  0x27   :  { %357 = vmatprep.subr.mxu1 %v176_v10  ;;  %281 = vperm.xlu0 %390, %v278_v25  }
  0x28   :  { %358 = vmatpush3.msra.mxu1 %v176_v10 }
  0x29   :  { %359 = vmatprep.subr.mxu1 %v175_v11 }
  0x2a   :  { %360 = vmatpush3.msra.mxu1 %v175_v11 }
  0x2b   :  { %361 = vmatprep.subr.mxu1 %v174_v12  ;;  %284 = vperm.xlu0 %390, %v279_v26  }
  0x2c   :  { %362 = vmatpush3.msra.mxu1 %v174_v12 }
  0x2d   :  { %363 = vmatprep.subr.mxu1 %v173_v13 }
  0x2e   :  { %364 = vmatpush3.msra.mxu1 %v173_v13 }
  0x2f   :  { %365 = vmatprep.subr.mxu1 %v172_v14 }
  0x30   :  { %366 = vmatpush3.msra.mxu1 %v172_v14 }
  0x31   :  { %367 = vmatprep.subr.mxu1 %v171_v15 }
  0x32   :  { %368 = vmatpush3.msra.mxu1 %v171_v15 }
  0x33   :  { %369 = vmatprep.subr.mxu1 %v170_v16 }
  0x34   :  { %370 = vmatpush3.msra.mxu1 %v170_v16 }
  0x35   :  { %371 = vmatprep.subr.mxu1 %v169_v17 }
  0x36   :  { %372 = vmatpush3.msra.mxu1 %v169_v17 }
  0x37   :  { %373 = vmatprep.subr.mxu1 %v168_v18 }
  0x38   :  { %374 = vmatpush3.msra.mxu1 %v168_v18 }
  0x39   :  { %375 = vmatprep.subr.mxu1 %v167_v19 }
  0x3a   :  { %376 = vmatpush3.msra.mxu1 %v167_v19 }
  0x3b   :  { %377 = vmatprep.subr.mxu1 %v166_v20 }
  0x3c   :  { %378 = vmatpush3.msra.mxu1 %v166_v20 }
  0x3d   :  { %379 = vmatprep.subr.mxu1 %v165_v21 }
  0x3e   :  { %380 = vmatpush3.msra.mxu1 %v165_v21 }
  0xa2   :  { %v282_v42 = vpop.permute.xlu0 %281 }
  0xa3   :  { %vm286_vm4 = vcmp.eq.s32.totalorder %v282_v42, 1 }
  0xa6   :  { %v285_v44 = vpop.permute.xlu0 %284 }
  0xa7   :  { %vm287_vm3 = vcmp.eq.s32.totalorder %v285_v44, 1 }
  0xe5   :  { %v348_v28 = vpop.f32.mrf.mxu0 }
  0xe6   :  { %v150_v29 = vadd.f32 %v348_v28, %v310_v27 }
  0xe7   :  { %v144_v30 = vpop.f32.mrf.mxu0 }
  0xe8   :  { %v156_v31 = vmul.f32 0.70710677, %v150_v29  ;;  %v145_v32 = vadd.f32 %v310_v27, %v144_v30  ;;  %v154_v39 = vmul.f32 0.5, %v150_v29 }
  0xea   :  { %391 = verf.f32 %v156_v31  ;;  %v155_v33 = vmul.f32 0.70710677, %v145_v32  ;;  %v153_v37 = vmul.f32 0.5, %v145_v32 }
  0xec   :  { %393 = verf.f32 %v155_v33 }
  0xf7   :  { %v392_v34 = vpop.eup %391 }
  0xf8   :  { %v160_v36 = vadd.f32 1.0, %v392_v34 }
  0xf9   :  { %v394_v35 = vpop.eup %393 }
  0xfa   :  { %v159_v38 = vadd.f32 1.0, %v394_v35  ;;  %v162_v41 = vmul.f32 %v160_v36, %v154_v39 }
  0xfc   :  { %v161_v40 = vmul.f32 %v159_v38, %v153_v37 }
  0xfe   :  { %381 = vmatprep.mubr.f32.mxu1 %v161_v40 }
  0xff   :  { %382 = vmatmul.mubr.f32.vlgmr.msra.gmra.mxu1 %v162_v41 }
 0x1bf   :  { %v383_v45 = vpop.f32.mrf.mxu1 }
 0x1c0   :  { %v273_v46 = vadd.f32 %v383_v45, %v313_v43 }
 0x1c1   :  { %v247_v47 = vpop.f32.mrf.mxu1 }
 0x1c2   :  { %v289_v48 = vsel %vm287_vm3, %v273_v46, 0.0  ;;  %v272_v49 = vadd.f32 %v313_v43, %v247_v47 }
 0x1c3   :  { %291 = vst [vmem:[#allocation8 + $0x8] sm:$0xff] %v289_v48 }
 0x1c4   :  { %v288_v50 = vsel %vm286_vm4, %v272_v49, 0.0 }
 0x1c5   :  { %290 = vst [vmem:[#allocation8] sm:$0xff] %v288_v50 }
 0x1c6   :  { %446 = shalt.err (!%p443_p0)
}
 0x1c7   :  { %303 = dma.vmem_to_hbm [thread:$0]  %s298_s17, 256, %s546_s6, [#allocation5], %s462_s24, %s462_s24, %s463_s25  }
 0x1c8   :  { %459 = dma.done.wait [#allocation5], 256  }
 0x1c9   :  { %460 = vsyncadd [#allocation5], 4294967040 }
 0x1ca   :  { %307 = vsyncpa [#allocation4], 1 }
 0x1cb   :  { %308 = vsyncpa [#allocation7], 1 }
 0x1cc   :  { %309 = vsyncpa [#allocation5], 1 }

</bundles_post_ra>
